<compile_context>
chip_gen: v7x
topology: tpu7x:2x2x1
jax: 0.10.0
libtpu: 0.0.40
codegen_flags: <defaults>
</compile_context>

<pallas_src>
import jax
import jax.numpy as jnp
from jax.experimental import pallas as pl
from jax.experimental.pallas import tpu as pltpu


_SQRT_2_OVER_PI = 0.7978845608028654
_GELU_COEF = 0.044715


def _gelu_tanh_f32(h):
    # Matches torch.nn.functional.gelu(..., approximate='tanh').
    return 0.5 * h * (1.0 + jnp.tanh(_SQRT_2_OVER_PI * (h + _GELU_COEF * h * h * h)))


def siglip_mlp_kernel(x_ref, w1_ref, b1_ref, w2_ref, b2_ref, o_ref, acc_ref):
    i_idx = pl.program_id(1)

    @pl.when(i_idx == 0)
    def _init():
        acc_ref[...] = jnp.zeros_like(acc_ref)

    # In-kernel cast of the activation tile to the matmul dtype (hides on VPU
    # under the MXU work); fc1 accumulates in f32 on the MXU.
    x = x_ref[...].astype(w1_ref.dtype)
    h = jnp.dot(x, w1_ref[...], preferred_element_type=jnp.float32)
    h = h + b1_ref[...]                      # broadcast (1, ti), f32
    g = _gelu_tanh_f32(h)                    # f32 GELU (VPU/EUP)

    # fc2 partial product over this I-slab, accumulated into f32 scratch.
    acc_ref[...] += jnp.dot(g.astype(w2_ref.dtype), w2_ref[...],
                            preferred_element_type=jnp.float32)

    @pl.when(i_idx == pl.num_programs(1) - 1)
    def _finalize():
        o_ref[...] = (acc_ref[...] + b2_ref[...]).astype(o_ref.dtype)


def _vmem_budget_bytes():
    """~75% of per-core VMEM (generation-aware), capped at 100 MiB."""
    try:
        cap = int(pltpu.get_tpu_info().vmem_capacity_bytes)
    except Exception:
        cap = 64 << 20  # conservative fallback: v7x per-TC VMEM
    return min(cap * 3 // 4, 100 << 20)


def _footprint_bytes(tm, ti, H, x_bytes, out_bytes, w_bytes):
    """Estimated VMEM footprint of one pipelined grid step."""
    return (2 * tm * H * x_bytes          # x tile (double-buffered, orig dtype)
            + 2 * H * ti * w_bytes        # fc1 weight slab (double-buffered)
            + 2 * ti * H * w_bytes        # fc2 weight slab (double-buffered)
            + 2 * ti * 4 + 2 * H * 4      # biases (f32)
            + 2 * tm * H * out_bytes      # out tile
            + tm * H * 4                  # f32 accumulator scratch
            + tm * ti * (4 + w_bytes))    # fc1/GELU f32 slab + matmul-dtype copy


def _pick_row_tile(M, tm_req):
    """Row tile: multiple of 16 (bf16 sublanes), >=2 tiles for megacore if M allows."""
    tm = max(16, (min(tm_req, 1024) // 16) * 16)
    while tm > 16 and pl.cdiv(M, tm) < 2:
        tm = max(16, (tm // 2 // 16) * 16)
    m_pad8 = max(8, ((M + 7) // 8) * 8)
    if tm > m_pad8:
        tm = m_pad8
    return tm


def _pick_intermediate_tile(I, tm, H, x_bytes, out_bytes, w_bytes, budget):
    """Prefer ti == padded-I (weights resident, fetched once); halve only if over budget."""
    ti = pl.cdiv(I, 128) * 128
    while ti > 512 and _footprint_bytes(tm, ti, H, x_bytes, out_bytes, w_bytes) > budget:
        ti = pl.cdiv(ti // 2, 128) * 128
    return ti


def siglip_mlp(x, w1, b1, w2, b2, *, tm=512, ti=None, matmul_dtype=jnp.bfloat16):
    """x: (B, S, H). w1: (H, I), b1: (I,), w2: (I, H), b2: (H,). Returns (B, S, H)."""
    B, S, H = x.shape
    I = w1.shape[1]
    M = B * S
    out_dtype = x.dtype

    x_bytes = jnp.dtype(x.dtype).itemsize
    out_bytes = jnp.dtype(out_dtype).itemsize
    w_bytes = jnp.dtype(matmul_dtype).itemsize

    budget = _vmem_budget_bytes()

    # ---- tile selection -------------------------------------------------
    tm = _pick_row_tile(M, tm)
    if ti is None:
        ti = _pick_intermediate_tile(I, tm, H, x_bytes, out_bytes, w_bytes, budget)
    ti = max(128, pl.cdiv(ti, 128) * 128)
    while _footprint_bytes(tm, ti, H, x_bytes, out_bytes, w_bytes) > budget and tm > 16:
        tm = max(16, (tm // 2 // 16) * 16)

    M_pad = pl.cdiv(M, tm) * tm
    I_pad = pl.cdiv(I, ti) * ti

    # ---- operand prep (weights would normally be pre-cast/padded at setup)
    x2 = x.reshape(M, H)
    if M_pad != M:
        x2 = jnp.pad(x2, ((0, M_pad - M), (0, 0)))

    w1c = w1 if w1.dtype == jnp.dtype(matmul_dtype) else w1.astype(matmul_dtype)
    w2c = w2 if w2.dtype == jnp.dtype(matmul_dtype) else w2.astype(matmul_dtype)
    b1_2 = b1.reshape(1, I).astype(jnp.float32)
    b2_2 = b2.reshape(1, H).astype(jnp.float32)
    if I_pad != I:
        # Zero padding is exact: padded columns give h = 0, gelu(0) = 0, and
        # the padded w2 rows are zero, so they contribute nothing to fc2.
        w1c = jnp.pad(w1c, ((0, 0), (0, I_pad - I)))
        b1_2 = jnp.pad(b1_2, ((0, 0), (0, I_pad - I)))
        w2c = jnp.pad(w2c, ((0, I_pad - I), (0, 0)))

    grid = (M_pad // tm, I_pad // ti)

    cost = pl.CostEstimate(
        flops=4 * M * H * I,
        transcendentals=M * I,
        bytes_accessed=(M * H * x_bytes + H * I * w_bytes + I * 4
                        + I * H * w_bytes + H * 4 + M * H * out_bytes),
    )

    vmem_limit = int(max(budget, 32 << 20))

    out = pl.pallas_call(
        siglip_mlp_kernel,
        out_shape=jax.ShapeDtypeStruct((M_pad, H), out_dtype),
        grid_spec=pltpu.PrefetchScalarGridSpec(
            num_scalar_prefetch=0,
            grid=grid,
            in_specs=[
                pl.BlockSpec((tm, H), lambda m, i: (m, 0)),   # x rows (orig dtype)
                pl.BlockSpec((H, ti), lambda m, i: (0, i)),   # fc1 weight slab
                pl.BlockSpec((1, ti), lambda m, i: (0, i)),   # fc1 bias slab
                pl.BlockSpec((ti, H), lambda m, i: (i, 0)),   # fc2 weight slab
                pl.BlockSpec((1, H), lambda m, i: (0, 0)),    # fc2 bias
            ],
            out_specs=pl.BlockSpec((tm, H), lambda m, i: (m, 0)),
            scratch_shapes=[pltpu.VMEM((tm, H), jnp.float32)],
        ),
        compiler_params=pltpu.CompilerParams(
            dimension_semantics=("parallel", "arbitrary"),
            vmem_limit_bytes=vmem_limit,
        ),
        cost_estimate=cost,
    )(x2, w1c, b1_2, w2c, b2_2)

    if M_pad != M:
        out = out[:M]
    return out.reshape(B, S, H)


if __name__ == "__main__":
    # Small, deterministic, lane-dense config: hidden=128, intermediate=512.
    B, S, H, I = 2, 16, 128, 512
    key = jax.random.PRNGKey(0)
    kx, kw1, kb1, kw2, kb2 = jax.random.split(key, 5)

    x = jax.random.normal(kx, (B, S, H), dtype=jnp.float32)
    # nn.Linear-style init: uniform(-1/sqrt(fan_in), 1/sqrt(fan_in))
    w1 = jax.random.uniform(kw1, (H, I), minval=-1.0, maxval=1.0, dtype=jnp.float32) / jnp.sqrt(H)
    b1 = jax.random.uniform(kb1, (I,), minval=-1.0, maxval=1.0, dtype=jnp.float32) / jnp.sqrt(H)
    w2 = jax.random.uniform(kw2, (I, H), minval=-1.0, maxval=1.0, dtype=jnp.float32) / jnp.sqrt(I)
    b2 = jax.random.uniform(kb2, (H,), minval=-1.0, maxval=1.0, dtype=jnp.float32) / jnp.sqrt(I)

    out = siglip_mlp(x, w1, b1, w2, b2)
    jax.block_until_ready(out)

    # Pure-JAX reference replicating the kernel's bf16 operand rounding
    # (matmul inputs in bf16, accumulation / GELU / bias in f32).
    bf = lambda a: a.astype(jnp.bfloat16).astype(jnp.float32)
    h_ref = bf(x.reshape(-1, H)) @ bf(w1) + b1
    g_ref = _gelu_tanh_f32(h_ref)
    ref = (bf(g_ref) @ bf(w2) + b2).reshape(B, S, H)

    assert out.shape == (B, S, H)
    assert jnp.allclose(out, ref, atol=2e-2, rtol=2e-2), "mismatch vs reference"

    print("KERNEL_OK")
</pallas_src>

<mosaic_0001>
module attributes {stable_mosaic.version = 11 : i64} {
  func.func @siglip_mlp_kernel(%arg0: i32, %arg1: i32, %arg2: memref<16x128xf32, #tpu.memory_space<vmem>>, %arg3: memref<128x512xbf16, #tpu.memory_space<vmem>>, %arg4: memref<1x512xf32, #tpu.memory_space<vmem>>, %arg5: memref<512x128xbf16, #tpu.memory_space<vmem>>, %arg6: memref<1x128xf32, #tpu.memory_space<vmem>>, %arg7: memref<16x128xf32, #tpu.memory_space<vmem>>, %arg8: memref<16x128xf32, #tpu.memory_space<vmem>>) attributes {dimension_semantics = [#tpu.dimension_semantics<parallel>, #tpu.dimension_semantics<arbitrary>], iteration_bounds = array<i64: 2, 1>, scalar_prefetch = 0 : i64, scratch_operands = 1 : i64, tpu.core_type = #tpu.core_type<tc>, window_params = [{transform_indices = @transform_0, window_bounds = array<i64: 16, 128>}, {transform_indices = @transform_1, window_bounds = array<i64: 128, 512>}, {transform_indices = @transform_2, window_bounds = array<i64: 1, 512>}, {transform_indices = @transform_3, window_bounds = array<i64: 512, 128>}, {pipeline_mode = #tpu.pipeline_mode<synchronous>, transform_indices = @transform_4, window_bounds = array<i64: 1, 128>}, {transform_indices = @transform_5, window_bounds = array<i64: 16, 128>}]} {
    %c0_i32 = arith.constant 0 : i32
    %0 = arith.cmpi eq, %arg1, %c0_i32 : i32
    %1 = arith.extui %0 : i1 to i32
    %c0_i32_0 = arith.constant 0 : i32
    %2 = arith.cmpi ne, %1, %c0_i32_0 : i32
    scf.if %2 {
      %cst_19 = arith.constant 0.000000e+00 : f32
      %32 = vector.broadcast %cst_19 : f32 to vector<16x128xf32>
      %c0_20 = arith.constant 0 : index
      %c0_21 = arith.constant 0 : index
      %33 = vector.load %arg8[%c0_20, %c0_21] : memref<16x128xf32, #tpu.memory_space<vmem>>, vector<16x128xf32>
      tpu.vector_store %arg8[%c0_20, %c0_21], %32 {strides = array<i32>} : memref<16x128xf32, #tpu.memory_space<vmem>>, vector<16x128xf32>,
    } else {
    }
    %c0 = arith.constant 0 : index
    %c0_1 = arith.constant 0 : index
    %3 = vector.load %arg2[%c0, %c0_1] : memref<16x128xf32, #tpu.memory_space<vmem>>, vector<16x128xf32>
    %4 = arith.truncf %3 : vector<16x128xf32> to vector<16x128xbf16>
    %c0_2 = arith.constant 0 : index
    %c0_3 = arith.constant 0 : index
    %5 = vector.load %arg3[%c0_2, %c0_3] : memref<128x512xbf16, #tpu.memory_space<vmem>>, vector<128x512xbf16>
    %cst = arith.constant dense<0.000000e+00> : vector<16x512xf32>
    %6 = tpu.matmul %4, %5, %cst {dimension_numbers = #tpu.dot_dimension_numbers<[1], [0], [0], [1], [0, 0, 1, 1], [], []>} : vector<16x128xbf16>, vector<128x512xbf16>, vector<16x512xf32> -> vector<16x512xf32>
    %c0_4 = arith.constant 0 : index
    %c0_5 = arith.constant 0 : index
    %7 = vector.load %arg4[%c0_4, %c0_5] : memref<1x512xf32, #tpu.memory_space<vmem>>, vector<1x512xf32>
    %8 = vector.broadcast %7 : vector<1x512xf32> to vector<16x512xf32>
    %9 = arith.addf %6, %8 : vector<16x512xf32>
    %cst_6 = arith.constant 5.000000e-01 : f32
    %10 = vector.broadcast %cst_6 : f32 to vector<16x512xf32>
    %11 = arith.mulf %10, %9 : vector<16x512xf32>
    %cst_7 = arith.constant 4.471500e-02 : f32
    %12 = vector.broadcast %cst_7 : f32 to vector<16x512xf32>
    %13 = arith.mulf %12, %9 : vector<16x512xf32>
    %14 = arith.mulf %13, %9 : vector<16x512xf32>
    %15 = arith.mulf %14, %9 : vector<16x512xf32>
    %16 = arith.addf %9, %15 : vector<16x512xf32>
    %cst_8 = arith.constant 0.797884583 : f32
    %17 = vector.broadcast %cst_8 : f32 to vector<16x512xf32>
    %18 = arith.mulf %17, %16 : vector<16x512xf32>
    %19 = math.tanh %18 : vector<16x512xf32>
    %cst_9 = arith.constant 1.000000e+00 : f32
    %20 = vector.broadcast %cst_9 : f32 to vector<16x512xf32>
    %21 = arith.addf %20, %19 : vector<16x512xf32>
    %22 = arith.mulf %11, %21 : vector<16x512xf32>
    %c0_10 = arith.constant 0 : index
    %c0_11 = arith.constant 0 : index
    %23 = vector.load %arg8[%c0_10, %c0_11] : memref<16x128xf32, #tpu.memory_space<vmem>>, vector<16x128xf32>
    %24 = arith.truncf %22 : vector<16x512xf32> to vector<16x512xbf16>
    %c0_12 = arith.constant 0 : index
    %c0_13 = arith.constant 0 : index
    %25 = vector.load %arg5[%c0_12, %c0_13] : memref<512x128xbf16, #tpu.memory_space<vmem>>, vector<512x128xbf16>
    %cst_14 = arith.constant dense<0.000000e+00> : vector<16x128xf32>
    %26 = tpu.matmul %24, %25, %cst_14 {dimension_numbers = #tpu.dot_dimension_numbers<[1], [0], [0], [1], [0, 0, 1, 1], [], []>} : vector<16x512xbf16>, vector<512x128xbf16>, vector<16x128xf32> -> vector<16x128xf32>
    %27 = arith.addf %23, %26 : vector<16x128xf32>
    %c0_15 = arith.constant 0 : index
    %c0_16 = arith.constant 0 : index
    %28 = vector.load %arg8[%c0_15, %c0_16] : memref<16x128xf32, #tpu.memory_space<vmem>>, vector<16x128xf32>
    tpu.vector_store %arg8[%c0_15, %c0_16], %27 {strides = array<i32>} : memref<16x128xf32, #tpu.memory_space<vmem>>, vector<16x128xf32>,
    %c0_i32_17 = arith.constant 0 : i32
    %29 = arith.cmpi eq, %arg1, %c0_i32_17 : i32
    %30 = arith.extui %29 : i1 to i32
    %c0_i32_18 = arith.constant 0 : i32
    %31 = arith.cmpi ne, %30, %c0_i32_18 : i32
    scf.if %31 {
      %c0_19 = arith.constant 0 : index
      %c0_20 = arith.constant 0 : index
      %32 = vector.load %arg8[%c0_19, %c0_20] : memref<16x128xf32, #tpu.memory_space<vmem>>, vector<16x128xf32>
      %c0_21 = arith.constant 0 : index
      %c0_22 = arith.constant 0 : index
      %33 = vector.load %arg6[%c0_21, %c0_22] : memref<1x128xf32, #tpu.memory_space<vmem>>, vector<1x128xf32>
      %34 = vector.broadcast %33 : vector<1x128xf32> to vector<16x128xf32>
      %35 = arith.addf %32, %34 : vector<16x128xf32>
      %c0_23 = arith.constant 0 : index
      %c0_24 = arith.constant 0 : index
      %36 = vector.load %arg7[%c0_23, %c0_24] : memref<16x128xf32, #tpu.memory_space<vmem>>, vector<16x128xf32>
      tpu.vector_store %arg7[%c0_23, %c0_24], %35 {strides = array<i32>} : memref<16x128xf32, #tpu.memory_space<vmem>>, vector<16x128xf32>,
    } else {
    }
    return
  }
  func.func @transform_0(%arg0: i32, %arg1: i32) -> (i32, i32) {
    %c0_i32 = arith.constant 0 : i32
    %c0_i32_0 = arith.constant 0 : i32
    return %arg0, %c0_i32 : i32, i32
  }
  func.func @transform_1(%arg0: i32, %arg1: i32) -> (i32, i32) {
    %c0_i32 = arith.constant 0 : i32
    %c0_i32_0 = arith.constant 0 : i32
    return %c0_i32, %arg1 : i32, i32
  }
  func.func @transform_2(%arg0: i32, %arg1: i32) -> (i32, i32) {
    %c0_i32 = arith.constant 0 : i32
    %c0_i32_0 = arith.constant 0 : i32
    return %c0_i32, %arg1 : i32, i32
  }
  func.func @transform_3(%arg0: i32, %arg1: i32) -> (i32, i32) {
    %c0_i32 = arith.constant 0 : i32
    %c0_i32_0 = arith.constant 0 : i32
    return %arg1, %c0_i32 : i32, i32
  }
  func.func @transform_4(%arg0: i32, %arg1: i32) -> (i32, i32) {
    %c0_i32 = arith.constant 0 : i32
    %c0_i32_0 = arith.constant 0 : i32
    %c0_i32_1 = arith.constant 0 : i32
    return %c0_i32, %c0_i32_0 : i32, i32
  }
  func.func @transform_5(%arg0: i32, %arg1: i32) -> (i32, i32) {
    %c0_i32 = arith.constant 0 : i32
    %c0_i32_0 = arith.constant 0 : i32
    return %arg0, %c0_i32 : i32, i32
  }
}

</mosaic_0001>

<bundles_post_ra>
// kernel: tpu_custom_call.1
= control target key start
LH: loop header
LB: loop body
LE: loop exit
PB: predicated region body
PF: predicated region fallthrough
CT: control target
= control target key end

     0   :  { %10 = vsyncpa [#allocation4], 0  ;;  %s2046_s0 = inlined_call_operand.hbm [shape: f32[32,128], index: 0, kind: input, shape index: {}]   ;;  %s2047_s1 = inlined_call_operand.hbm [shape: bf16[128,512], index: 1, kind: input, shape index: {}]   ;;  %s2048_s2 = inlined_call_operand.vmem [shape: f32[1,512], index: 2, kind: input, shape index: {}]   ;;  %s2049_s3 = inlined_call_operand.hbm [shape: bf16[512,128], index: 3, kind: input, shape index: {}]   ;;  %s2050_s4 = inlined_call_operand.vmem [shape: f32[1,128], index: 4, kind: input, shape index: {}]   ;;  %s2051_s5 = inlined_call_operand.hbm [shape: f32[32,128], index: 5, kind: output, shape index: {}]  }
   0x1   :  { %12 = vsyncpa [#allocation4 + $0x1], 0 }
   0x2   :  { %13 = vsyncpa [#allocation7], 0 }
   0x3   :  { %14 = vsyncpa [#allocation5], 0 }
   0x4   :  { %16 = vsyncpa [#allocation5 + $0x1], 0  ;;  %s1735_s18 = smov 0   ;;  %s1737_s19 = smov 0  }
   0x5   :  { %s1739_s20 = smov 0   ;;  %s1741_s21 = smov 0  }
   0x6   :  { %s1743_s22 = smov 0   ;;  %s1745_s23 = smov 0  }
   0x7 LB: > { %s1199_s24 = sadd.s32 4294967295, %s1690_s23   ;;  %s1200_s25 = sadd.s32 4294967294, %s1690_s23   ;;  %s1690_s23 = sphi %s1745_s23, %s22_s23   ;;  %s1686_s22 = sphi %s1743_s22, %s2073_s22   ;;  %s1682_s21 = sphi %s1741_s21, %s2072_s21   ;;  %s1678_s20 = sphi %s1739_s20, %s2071_s20   ;;  %s1674_s19 = sphi %s1737_s19, %s2070_s19   ;;  %s1670_s18 = sphi %s1735_s18, %s2069_s18  }
   0x8   : > { %p54_p0 = scmp.ne.s32.totalorder %s1674_s19, %s1670_s18  ;;  %p1769_p1 = scmp.eq.s32.totalorder %s1199_s24, 0 }
   0x9   : > { %p1773_p2 = scmp.eq.s32.totalorder %s1199_s24, 1  ;;  %p183_p3 = scmp.eq.s32.totalorder %s1200_s25, 1 }
   0xa   : > { %s2056_s26 = scalar_select %p1769_p1, 1, 0 }
   0xb   : > { %p1779_p4 = por %p1769_p1, %p54_p0  ;;  %p1201_p5 = scmp.ge.s32.totalorder %s1690_s23, 1 }
   0xc   : > { %p1784_p6 = por %p183_p3, %p54_p0  ;;  %p190_p7 = scmp.lt.s32.totalorder %s1690_s23, 3 }
   0xd   : > { %s2058_s28 = scalar_select %p1779_p4, 1, 0 }
   0xe   : > { %s2059_s29 = scalar_select %p1784_p6, 1, 0 }
   0xf   : > { %p1789_p8 = pnand %p1201_p5, %p190_p7  ;;  %s1692_s6 = smov [#allocation6]  }
  0x10   : > { %s205_s7 = sshll.u32 %s1692_s6, 4  ;;  %s1693_s9 = smov [#allocation8]   ;;  %s1793_s7 = int_to_ptr.vmem [resolvable:$true] %s205_s7 }
  0x11   : > { %p1342_p9 = pneg %p1789_p8  ;;  %s229_s10 = sshll.u32 %s1693_s9, 4  ;;  %s1804_s10 = int_to_ptr.vmem [resolvable:$true] %s229_s10 }
  0x12   : > { %s1518_s13 = scalar_lea.hbm %s2047_s1, 4096 }
  0x13   : > { %p1800_p11 = pnand %p1342_p9, %p1769_p1  ;;  %p1519_p12 = scmp.ne.s32.totalorder %s2047_s1, %s1518_s13 }
  0x14   : > { %p1525_p5 = scmp.lt.u32.totalorder %s1518_s13, %s2047_s1 }
  0x15   : > { %p1520_p13 = pneg %p1800_p11 }
  0x17   : > { %p1521_p0 = pnand %p1520_p13, %p1519_p12 }
  0x19   : > { %p1522_p3 = pneg %p1521_p0 }
  0x1b   : > { %p1527_p7 = pnand %p1525_p5, %p1522_p3 }
  0x1d   : > { %1530 = shalt.err (!%p1527_p7)
}
  0x1e   : > { %s1531_s24 = scalar_lea.vmem %s1793_s7, 4096  ;;  %p1539_p1 = scmp.lt.s32.totalorder %s1793_s7, %s1793_s7 }
  0x1f   : > { %p1532_p9 = scmp.ne.s32.totalorder %s1793_s7, %s1531_s24  ;;  %p1540_p12 = scmp.lt.s32.totalorder %s1531_s24, %s1531_s24 }
  0x21   : > { %p1534_p10 = pnand %p1532_p9, %p1520_p13  ;;  %p1541_p0 = por %p1540_p12, %p1539_p1 }
  0x23   : > { %p1535_p6 = pneg %p1534_p10 }
  0x25   : > { %p1542_p4 = pnand %p1541_p0, %p1535_p6 }
  0x27   : > { %1545 = shalt.err (!%p1542_p4)
}
  0x28   : > { %s1694_s25 = smov 256   ;;  %s1695_s6 = smov 16  }
  0x29   : > { %1345 = dma.hbm_to_vmem [thread:$0]  (!%p1800_p11), %s2047_s1, 4096, %s1793_s7, [#allocation7], %s1694_s25, %s1694_s25, %s1695_s6  }
  0x2a   : > { %s1546_s14 = scalar_lea.hbm %s2049_s3, 4096 }
  0x2b   : > { %p1547_p1 = scmp.ne.s32.totalorder %s2049_s3, %s1546_s14  ;;  %p1553_p10 = scmp.lt.u32.totalorder %s1546_s14, %s2049_s3 }
  0x2d   : > { %p1549_p4 = pnand %p1547_p1, %p1520_p13 }
  0x2f   : > { %p1550_p6 = pneg %p1549_p4 }
  0x31   : > { %p1555_p3 = pnand %p1553_p10, %p1550_p6 }
  0x33   : > { %1558 = shalt.err (!%p1555_p3)
}
  0x34   : > { %s1559_s7 = scalar_lea.vmem %s1804_s10, 4096  ;;  %p1567_p12 = scmp.lt.s32.totalorder %s1804_s10, %s1804_s10 }
  0x35   : > { %p1560_p5 = scmp.ne.s32.totalorder %s1804_s10, %s1559_s7  ;;  %p1568_p0 = scmp.lt.s32.totalorder %s1559_s7, %s1559_s7 }
  0x37   : > { %p1562_p7 = pnand %p1560_p5, %p1520_p13  ;;  %p1569_p1 = por %p1568_p0, %p1567_p12 }
  0x39   : > { %p1563_p9 = pneg %p1562_p7 }
  0x3b   : > { %p1570_p4 = pnand %p1569_p1, %p1563_p9 }
  0x3d   : > { %1573 = shalt.err (!%p1570_p4)
}
  0x3e   : > { %s1696_s25 = smov 64   ;;  %s1697_s6 = smov 4  }
  0x3f   : > { %1348 = dma.hbm_to_vmem [thread:$0]  (!%p1800_p11), %s2049_s3, 4096, %s1804_s10, [#allocation7], %s1696_s25, %s1696_s25, %s1697_s6  }
  0x40   : > { %s34_s12 = sadd.s32 1, %s1686_s22  ;;  %s41_s13 = sadd.s32 1, %s1678_s20 }
  0x41   : > { %p36_p13 = scmp.ge.s32.totalorder %s34_s12, 2  ;;  %p48_p6 = scmp.ne.s32.totalorder %s1678_s20, %s1674_s19 }
  0x42   : > { %p49_p10 = scmp.eq.s32.totalorder %s1690_s23, 0  ;;  %p1359_p3 = scmp.lt.s32.totalorder %s1690_s23, 2 }
  0x43   : > { %s2075_s12 = smov (%p36_p13, %s34_s12), 0  ;;  %p1868_p7 = por %p1773_p2, %p48_p6 }
  0x44   : > { %p50_p5 = por %p49_p10, %p48_p6  ;;  %s38_s8 = ssub.s32 %s1686_s22, %s2075_s12 }
  0x45   : > { %s2062_s14 = scalar_select %p1868_p7, 1, 0 }
  0x46   : > { %s246_s15 = sand.u32 1, %s1678_s20   ;;  %p39_p9 = scmp.eq.s32.totalorder %s38_s8, 0 }
  0x47   : > { %s1206_s10 = sshll.u32 %s246_s15, 4  ;;  %s1284_s16 = sshll.u32 %s1686_s22, 8 }
  0x48   : > { %s1877_s17 = scalar_select %p39_p9, %s1678_s20, %s41_s13  }
  0x49   : > { %s1882_s25 = scalar_lea.hbm %s2046_s0, %s1284_s16  ;;  %s250_s27 = scalar_lea.vmem [#allocation3], %s1206_s10 }
  0x4a   : > { %s257_s6 = sshll.u32 %s250_s27, 4  ;;  %p1886_p2 = pnand %p1359_p3, %p50_p5  ;;  %s1890_s6 = int_to_ptr.vmem [resolvable:$true] %s257_s6 }
  0x4b   : > { %s1892_s11 = scalar_lea.sflag [#allocation4], %s246_s15  ;;  %s1574_s13 = scalar_lea.hbm %s1882_s25, 256 }
  0x4c   : > { %p1575_p11 = scmp.ne.s32.totalorder %s1882_s25, %s1574_s13  ;;  %p1576_p12 = pneg %p1886_p2 }
  0x4d   : > { %s1579_s16 = scalar_lea.hbm %s2046_s0, 512  ;;  %p1580_p4 = scmp.lt.u32.totalorder %s1882_s25, %s2046_s0 }
  0x4e   : > { %p1577_p0 = pnand %p1576_p12, %p1575_p11  ;;  %p1581_p13 = scmp.lt.u32.totalorder %s1579_s16, %s1574_s13 }
  0x4f   : > { %p1583_p10 = scmp.lt.u32.totalorder %s1574_s13, %s1882_s25 }
  0x50   : > { %p1578_p1 = pneg %p1577_p0  ;;  %p1582_p6 = por %p1581_p13, %p1580_p4 }
  0x52   : > { %p1584_p3 = por %p1583_p10, %p1582_p6 }
  0x54   : > { %p1585_p5 = pnand %p1584_p3, %p1578_p1 }
  0x56   : > { %1588 = shalt.err (!%p1585_p5)
}
  0x57   : > { %s1589_s15 = scalar_lea.vmem %s1890_s6, 256  ;;  %s1698_s27 = smov [#allocation3]  }
  0x58   : > { %p1590_p9 = scmp.ne.s32.totalorder %s1890_s6, %s1589_s15  ;;  %s1594_s8 = sshll.u32 %s1698_s27, 4  ;;  %s1595_s8 = int_to_ptr.vmem [resolvable:$false] %s1594_s8 }
  0x59   : > { %s1596_s10 = scalar_lea.vmem %s1595_s8, 512  ;;  %p1597_p7 = scmp.lt.s32.totalorder %s1890_s6, %s1595_s8 }
  0x5a   : > { %p1592_p11 = pnand %p1590_p9, %p1576_p12  ;;  %p1598_p4 = scmp.lt.s32.totalorder %s1596_s10, %s1589_s15 }
  0x5c   : > { %p1593_p0 = pneg %p1592_p11  ;;  %p1599_p13 = por %p1598_p4, %p1597_p7 }
  0x5e   : > { %p1600_p6 = pnand %p1599_p13, %p1593_p0 }
  0x60   : > { %1603 = shalt.err (!%p1600_p6)
}
  0x61   : > { %s1699_s13 = smov 128   ;;  %s1700_s16 = smov 8  }
  0x62   : > { %1352 = dma.hbm_to_vmem [thread:$0]  (!%p1886_p2), %s1882_s25, 256, %s1890_s6, %s1892_s11, %s1699_s13, %s1699_s13, %s1700_s16  }
  0x63   : > { %269 = sbr.rel (%p1789_p8) target bundleno = 629 (0x275), region = 40  ;;  %s1923_s24 = sand.u32 (!%p1789_p8), 1, %s1674_s19  }
  0x64   : > { %s1210_s7 = sshll.u32 (!%p1789_p8), %s1923_s24, 4  ;;  %s272_s15 = scalar_lea.sflag (!%p1789_p8), [#allocation4], %s1923_s24 }
  0x65   : > { %s1929_s27 = scalar_lea.vmem (!%p1789_p8), [#allocation3], %s1210_s7  ;;  %p2064_p7 = scmp.ne.s32.totalorder (!%p1789_p8), %s2058_s28, 0 }
  0x6a   : > { %1657 = dma.done.wait (%p2064_p7), %s272_s15, 256  }
  0x6b   : > { %1659 = vsyncadd (%p2064_p7), %s272_s15, 4294967040  ;;  %p2065_p2 = scmp.ne.s32.totalorder %s2056_s26, 0 }
  0x6d   : > { %1661 = dma.done.wait (%p2065_p2), [#allocation7], 8192  }
  0x6e   : > { %1663 = vsyncadd (%p2065_p2), [#allocation7], 4294959104  ;;  %v1701_v0 = vmov 0   ;;  %v1422_v1 = vld [vmem:[#allocation6 + $0x4] ss:$16 sps:$4 sm:$0xff]   ;;  %v331_v34 = vld [vmem:[%s1929_s27 + $0x8] sm:$0xff] }
  0x6f   : > { %579 = vmatprep.mubr.bf16.mxu0 %v1701_v0  ;;  %622 = vmatprep.mubr.bf16.mxu1 %v1701_v0  ;;  %v1424_v2 = vld [vmem:[#allocation6 + $0xc] ss:$16 sps:$4 sm:$0xff]   ;;  %v1426_v3 = vld [vmem:[#allocation6] ss:$16 sps:$4 sm:$0xff]   ;;  %v1427_v4 = vld [vmem:[#allocation6 + $0x8] ss:$16 sps:$4 sm:$0xff]  }
  0x70   : > { %547 = vmatprep.subr.bf16.mxu0 %v1422_v1  ;;  %590 = vmatprep.subr.bf16.mxu1 %v1424_v2  ;;  %v1428_v5 = vld [vmem:[#allocation6 + $0x24] ss:$16 sps:$4 sm:$0xff]   ;;  %v1430_v6 = vld [vmem:[#allocation6 + $0x2c] ss:$16 sps:$4 sm:$0xff]   ;;  %v1432_v7 = vld [vmem:[#allocation6 + $0x20] ss:$16 sps:$4 sm:$0xff]  }
  0x71   : > { %548 = vmatpush1.bf16.msra.mxu0 %v1426_v3  ;;  %591 = vmatpush1.bf16.msra.mxu1 %v1427_v4  ;;  %v1433_v8 = vld [vmem:[#allocation6 + $0x28] ss:$16 sps:$4 sm:$0xff]   ;;  %v1434_v9 = vld [vmem:[#allocation6 + $0x44] ss:$16 sps:$4 sm:$0xff]   ;;  %v1436_v10 = vld [vmem:[#allocation6 + $0x4c] ss:$16 sps:$4 sm:$0xff]   ;;  %v367_v4 = vlaneseq }
  0x72   : > { %549 = vmatprep.subr.bf16.mxu0 %v1428_v5  ;;  %592 = vmatprep.subr.bf16.mxu1 %v1430_v6  ;;  %v1438_v11 = vld [vmem:[#allocation6 + $0x40] ss:$16 sps:$4 sm:$0xff]   ;;  %v1439_v12 = vld [vmem:[#allocation6 + $0x48] ss:$16 sps:$4 sm:$0xff]   ;;  %v1440_v13 = vld [vmem:[#allocation6 + $0x64] ss:$16 sps:$4 sm:$0xff]  }
  0x73   : > { %v1442_v14 = vld [vmem:[#allocation6 + $0x6c] ss:$16 sps:$4 sm:$0xff]   ;;  %v1444_v15 = vld [vmem:[#allocation6 + $0x60] ss:$16 sps:$4 sm:$0xff]   ;;  %v1445_v16 = vld [vmem:[#allocation6 + $0x68] ss:$16 sps:$4 sm:$0xff]  }
  0x74   : > { %v1446_v17 = vld [vmem:[#allocation6 + $0x84] ss:$16 sps:$4 sm:$0xff]   ;;  %v1448_v18 = vld [vmem:[#allocation6 + $0x8c] ss:$16 sps:$4 sm:$0xff]   ;;  %v1450_v19 = vld [vmem:[#allocation6 + $0x80] ss:$16 sps:$4 sm:$0xff]  }
  0x75   : > { %550 = vmatpush1.bf16.msra.mxu0 %v1432_v7  ;;  %593 = vmatpush1.bf16.msra.mxu1 %v1433_v8  ;;  %v1451_v20 = vld [vmem:[#allocation6 + $0x88] ss:$16 sps:$4 sm:$0xff]   ;;  %v1452_v21 = vld [vmem:[#allocation6 + $0xa4] ss:$16 sps:$4 sm:$0xff]   ;;  %v1454_v22 = vld [vmem:[#allocation6 + $0xac] ss:$16 sps:$4 sm:$0xff]  }
  0x76   : > { %551 = vmatprep.subr.bf16.mxu0 %v1434_v9  ;;  %594 = vmatprep.subr.bf16.mxu1 %v1436_v10  ;;  %v1456_v23 = vld [vmem:[#allocation6 + $0xa0] ss:$16 sps:$4 sm:$0xff]   ;;  %v1457_v24 = vld [vmem:[#allocation6 + $0xa8] ss:$16 sps:$4 sm:$0xff]   ;;  %v1458_v25 = vld [vmem:[#allocation6 + $0xc4] ss:$16 sps:$4 sm:$0xff]  }
  0x77   : > { %v1460_v26 = vld [vmem:[#allocation6 + $0xcc] ss:$16 sps:$4 sm:$0xff]   ;;  %v1462_v27 = vld [vmem:[#allocation6 + $0xc0] ss:$16 sps:$4 sm:$0xff]   ;;  %v1463_v28 = vld [vmem:[#allocation6 + $0xc8] ss:$16 sps:$4 sm:$0xff]  }
  0x78   : > { %v1464_v29 = vld [vmem:[#allocation6 + $0xe4] ss:$16 sps:$4 sm:$0xff]   ;;  %v1466_v30 = vld [vmem:[#allocation6 + $0xec] ss:$16 sps:$4 sm:$0xff]   ;;  %v1468_v31 = vld [vmem:[#allocation6 + $0xe0] ss:$16 sps:$4 sm:$0xff]  }
  0x79   : > { %552 = vmatpush1.bf16.msra.mxu0 %v1438_v11  ;;  %595 = vmatpush1.bf16.msra.mxu1 %v1439_v12  ;;  %v1469_v32 = vld [vmem:[#allocation6 + $0xe8] ss:$16 sps:$4 sm:$0xff]   ;;  %v330_v33 = vld [vmem:[%s1929_s27] sm:$0xff]  ;;  %v368_v5 = vshrl.u32 %v367_v4, 7  ;;  %s313_s6 = scalar_lea.vmem [#allocation9], %s1210_s7  ;;  %s1285_s11 = sshll.u32 %s1682_s21, 8 }
  0x7a   : > { %553 = vmatprep.subr.bf16.mxu0 %v1440_v13  ;;  %596 = vmatprep.subr.bf16.mxu1 %v1442_v14  ;;  %v332_v35 = vpack.c.bf16 %v331_v34, %v330_v33  ;;  %v1470_v36 = vld [vmem:[#allocation8 + $0x40] sm:$0xff]   ;;  %v1474_v40 = vld [vmem:[#allocation8 + $0x48] sm:$0xff]   ;;  %v1478_v44 = vld [vmem:[#allocation8 + $0x50] sm:$0xff]   ;;  %s1083_s9 = sshll.u32 %s313_s6, 4  ;;  %s1997_s13 = scalar_lea.hbm %s2051_s5, %s1285_s11  ;;  %s1992_s9 = int_to_ptr.vmem [resolvable:$true] %s1083_s9 }
  0x7b   : > { %v1471_v37 = vld [vmem:[#allocation8 + $0xc0] sm:$0xff]   ;;  %v1475_v41 = vld [vmem:[#allocation8 + $0xc8] sm:$0xff]   ;;  %v1479_v45 = vld [vmem:[#allocation8 + $0xd0] sm:$0xff]   ;;  %v369_v6 = vsub.s32 0, %v368_v5  ;;  %v377_v7 = vsub.s32 2, %v368_v5  ;;  %v373_v9 = vsub.s32 1, %v368_v5 }
  0x7c   : > { %v1472_v38 = vld [vmem:[#allocation8] sm:$0xff]   ;;  %v1476_v42 = vld [vmem:[#allocation8 + $0x8] sm:$0xff]   ;;  %v1480_v46 = vld [vmem:[#allocation8 + $0x10] sm:$0xff]   ;;  %v381_v10 = vsub.s32 3, %v368_v5  ;;  %s1070_s16 = scalar_lea.sflag [#allocation5], %s1923_s24  ;;  %s1604_s7 = scalar_lea.vmem %s1992_s9, 256 }
  0x7d   : > { %554 = vmatpush1.bf16.msra.mxu0 %v1444_v15  ;;  %597 = vmatpush1.bf16.msra.mxu1 %v1445_v16  ;;  %v1473_v39 = vld [vmem:[#allocation8 + $0x80] sm:$0xff]   ;;  %v1477_v43 = vld [vmem:[#allocation8 + $0x88] sm:$0xff]   ;;  %v1481_v47 = vld [vmem:[#allocation8 + $0x90] sm:$0xff]   ;;  %p1605_p8 = scmp.ne.s32.totalorder %s1992_s9, %s1604_s7  ;;  %p2066_p12 = scmp.ne.s32.totalorder %s2062_s14, 0 }
  0x7e   : > { %555 = vmatprep.subr.bf16.mxu0 %v1446_v17  ;;  %598 = vmatprep.subr.bf16.mxu1 %v1448_v18  ;;  %v1482_v48 = vld [vmem:[#allocation8 + $0x58] sm:$0xff]   ;;  %v1486_v52 = vld [vmem:[#allocation8 + $0x60] sm:$0xff]   ;;  %v1490_v56 = vld [vmem:[#allocation8 + $0x68] sm:$0xff]   ;;  %s1702_s21 = smov [#allocation9]  }
  0x7f   : > { %v1483_v49 = vld [vmem:[#allocation8 + $0xd8] sm:$0xff]   ;;  %v1487_v53 = vld [vmem:[#allocation8 + $0xe0] sm:$0xff]   ;;  %v1491_v57 = vld [vmem:[#allocation8 + $0xe8] sm:$0xff]   ;;  %p1606_p1 = pnand %p1605_p8, %p2066_p12  ;;  %s1608_s15 = sshll.u32 %s1702_s21, 4  ;;  %s1609_s15 = int_to_ptr.vmem [resolvable:$false] %s1608_s15 }
  0x80   : > { %v1484_v50 = vld [vmem:[#allocation8 + $0x18] sm:$0xff]   ;;  %v1488_v54 = vld [vmem:[#allocation8 + $0x20] sm:$0xff]   ;;  %v1492_v58 = vld [vmem:[#allocation8 + $0x28] sm:$0xff]   ;;  %s1610_s27 = scalar_lea.vmem %s1609_s15, 512  ;;  %p1611_p3 = scmp.lt.s32.totalorder %s1992_s9, %s1609_s15 }
  0x81   : > { %556 = vmatpush1.bf16.msra.mxu0 %v1450_v19  ;;  %599 = vmatpush1.bf16.msra.mxu1 %v1451_v20  ;;  %v1485_v51 = vld [vmem:[#allocation8 + $0x98] sm:$0xff]   ;;  %v1489_v55 = vld [vmem:[#allocation8 + $0xa0] sm:$0xff]   ;;  %v1493_v59 = vld [vmem:[#allocation8 + $0xa8] sm:$0xff]   ;;  %p1607_p10 = pneg %p1606_p1  ;;  %p1612_p5 = scmp.lt.s32.totalorder %s1610_s27, %s1604_s7 }
  0x82   : > { %557 = vmatprep.subr.bf16.mxu0 %v1452_v21  ;;  %600 = vmatprep.subr.bf16.mxu1 %v1454_v22  ;;  %v1494_v60 = vld [vmem:[#allocation8 + $0x70] sm:$0xff]   ;;  %v1498_v0 = vld [vmem:[#allocation8 + $0x78] sm:$0xff]   ;;  %v365_v8 = vld [vmem:[%s2048_s2] sm:$0xf] }
  0x83   : > { %v1495_v61 = vld [vmem:[#allocation8 + $0xf0] sm:$0xff]   ;;  %v1499_v1 = vld [vmem:[#allocation8 + $0xf8] sm:$0xff]   ;;  %v370_v11 = vrot.slane %v365_v8, %v369_v6  ;;  %v378_v12 = vrot.slane %v365_v8, %v377_v7  ;;  %v374_v13 = vrot.slane %v365_v8, %v373_v9  ;;  %v382_v14 = vrot.slane %v365_v8, %v381_v10  ;;  %p1613_p9 = por %p1612_p5, %p1611_p3 }
  0x84   : > { %v1496_v62 = vld [vmem:[#allocation8 + $0x30] sm:$0xff]   ;;  %v1500_v2 = vld [vmem:[#allocation8 + $0x38] sm:$0xff]  }
  0x85   : > { %558 = vmatpush1.bf16.msra.mxu0 %v1456_v23  ;;  %601 = vmatpush1.bf16.msra.mxu1 %v1457_v24  ;;  %v1497_v63 = vld [vmem:[#allocation8 + $0xb0] sm:$0xff]   ;;  %v1501_v3 = vld [vmem:[#allocation8 + $0xb8] sm:$0xff]   ;;  %p1614_p11 = pnand %p1613_p9, %p1607_p10 }
  0x86   : > { %559 = vmatprep.subr.bf16.mxu0 %v1458_v25  ;;  %602 = vmatprep.subr.bf16.mxu1 %v1460_v26 }
  0x89   : > { %560 = vmatpush1.bf16.msra.mxu0 %v1462_v27  ;;  %603 = vmatpush1.bf16.msra.mxu1 %v1463_v28 }
  0x8a   : > { %561 = vmatprep.subr.bf16.mxu0 %v1464_v29  ;;  %604 = vmatprep.subr.bf16.mxu1 %v1466_v30 }
  0x8d   : > { %562 = vmatpush1.bf16.msra.mxu0 %v1468_v31  ;;  %605 = vmatpush1.bf16.msra.mxu1 %v1469_v32 }
  0x8e   : > { %1286 = vmatprep.subr.bf16.mxu0 %v1470_v36  ;;  %1308 = vmatprep.subr.bf16.mxu1 %v1471_v37 }
  0x90   : > { %580 = vmatmul.mubr.bf16.vlgmr.msra.gmra.mrb[0].mxu0 %v332_v35  ;;  %623 = vmatmul.mubr.bf16.vlgmr.msra.gmra.mrb[0].mxu1 %v332_v35 }
  0x91   : > { %1287 = vmatpush3.bf16.msra.mxu0 %v1472_v38  ;;  %1309 = vmatpush3.bf16.msra.mxu1 %v1473_v39 }
  0x92   : > { %1288 = vmatprep.subr.bf16.mxu0 %v1474_v40  ;;  %1310 = vmatprep.subr.bf16.mxu1 %v1475_v41 }
  0x95   : > { %1289 = vmatpush3.bf16.msra.mxu0 %v1476_v42  ;;  %1311 = vmatpush3.bf16.msra.mxu1 %v1477_v43 }
  0x96   : > { %1290 = vmatprep.subr.bf16.mxu0 %v1478_v44  ;;  %1312 = vmatprep.subr.bf16.mxu1 %v1479_v45 }
  0x99   : > { %1291 = vmatpush3.bf16.msra.mxu0 %v1480_v46  ;;  %1313 = vmatpush3.bf16.msra.mxu1 %v1481_v47 }
  0x9a   : > { %1292 = vmatprep.subr.bf16.mxu0 %v1482_v48  ;;  %1314 = vmatprep.subr.bf16.mxu1 %v1483_v49 }
  0x9d   : > { %1293 = vmatpush3.bf16.msra.mxu0 %v1484_v50  ;;  %1315 = vmatpush3.bf16.msra.mxu1 %v1485_v51 }
  0x9e   : > { %1294 = vmatprep.subr.bf16.mxu0 %v1486_v52  ;;  %1316 = vmatprep.subr.bf16.mxu1 %v1487_v53 }
  0xa1   : > { %1295 = vmatpush3.bf16.msra.mxu0 %v1488_v54  ;;  %1317 = vmatpush3.bf16.msra.mxu1 %v1489_v55 }
  0xa2   : > { %1296 = vmatprep.subr.bf16.mxu0 %v1490_v56  ;;  %1318 = vmatprep.subr.bf16.mxu1 %v1491_v57 }
  0xa5   : > { %1297 = vmatpush3.bf16.msra.mxu0 %v1492_v58  ;;  %1319 = vmatpush3.bf16.msra.mxu1 %v1493_v59 }
  0xa6   : > { %1298 = vmatprep.subr.bf16.mxu0 %v1494_v60  ;;  %1320 = vmatprep.subr.bf16.mxu1 %v1495_v61 }
  0xa9   : > { %1299 = vmatpush3.bf16.msra.mxu0 %v1496_v62  ;;  %1321 = vmatpush3.bf16.msra.mxu1 %v1497_v63 }
  0xaa   : > { %1300 = vmatprep.subr.bf16.mxu0 %v1498_v0  ;;  %1322 = vmatprep.subr.bf16.mxu1 %v1499_v1 }
  0xad   : > { %1301 = vmatpush3.bf16.msra.mxu0 %v1500_v2  ;;  %1323 = vmatpush3.bf16.msra.mxu1 %v1501_v3 }
 0x163   : > { %v581_v15 = vpop.f32.mrb[0].mxu0  ;;  %v624_v16 = vpop.f32.mrb[0].mxu1 }
 0x164   : > { %v1944_v17 = vadd.f32 %v581_v15, %v370_v11  ;;  %v1946_v18 = vadd.f32 %v624_v16, %v378_v12  ;;  %v583_v19 = vpop.f32.mrb[1].mxu0  ;;  %v626_v20 = vpop.f32.mrb[1].mxu1 }
 0x165   : > { %v1948_v21 = vadd.f32 %v583_v19, %v374_v13  ;;  %v1950_v22 = vadd.f32 %v626_v20, %v382_v14  ;;  %v585_v23 = vpop.f32.mrb[2].mxu0  ;;  %v628_v24 = vpop.f32.mrb[2].mxu1 }
 0x166   : > { %v641_v25 = vmul.f32 0.044715, %v1944_v17  ;;  %v643_v26 = vmul.f32 0.044715, %v1946_v18  ;;  %v586_v27 = vadd.f32 %v585_v23, %v370_v11  ;;  %v629_v28 = vadd.f32 %v628_v24, %v378_v12  ;;  %v587_v29 = vpop.f32.mrb[3].mxu0  ;;  %v630_v30 = vpop.f32.mrb[3].mxu1 }
 0x167   : > { %v642_v31 = vmul.f32 0.044715, %v1948_v21  ;;  %v644_v32 = vmul.f32 0.044715, %v1950_v22  ;;  %v1956_v33 = vadd.f32 %v587_v29, %v374_v13  ;;  %v1958_v34 = vadd.f32 %v630_v30, %v382_v14 }
 0x168   : > { %v649_v35 = vmul.f32 %v641_v25, %v1944_v17  ;;  %v651_v36 = vmul.f32 %v643_v26, %v1946_v18  ;;  %v645_v37 = vmul.f32 0.044715, %v586_v27  ;;  %v647_v38 = vmul.f32 0.044715, %v629_v28 }
 0x169   : > { %v650_v39 = vmul.f32 %v642_v31, %v1948_v21  ;;  %v652_v40 = vmul.f32 %v644_v32, %v1950_v22  ;;  %v646_v41 = vmul.f32 0.044715, %v1956_v33  ;;  %v648_v42 = vmul.f32 0.044715, %v1958_v34 }
 0x16a   : > { %v657_v43 = vmul.f32 %v649_v35, %v1944_v17  ;;  %v659_v44 = vmul.f32 %v651_v36, %v1946_v18  ;;  %v653_v45 = vmul.f32 %v645_v37, %v586_v27  ;;  %v655_v46 = vmul.f32 %v647_v38, %v629_v28 }
 0x16b   : > { %v658_v47 = vmul.f32 %v650_v39, %v1948_v21  ;;  %v660_v48 = vmul.f32 %v652_v40, %v1950_v22  ;;  %v654_v49 = vmul.f32 %v646_v41, %v1956_v33  ;;  %v656_v50 = vmul.f32 %v648_v42, %v1958_v34 }
 0x16c   : > { %v665_v51 = vadd.f32 %v657_v43, %v1944_v17  ;;  %v667_v52 = vadd.f32 %v659_v44, %v1946_v18  ;;  %v661_v53 = vmul.f32 %v653_v45, %v586_v27  ;;  %v663_v54 = vmul.f32 %v655_v46, %v629_v28 }
 0x16d   : > { %v662_v55 = vmul.f32 %v654_v49, %v1956_v33  ;;  %v664_v56 = vmul.f32 %v656_v50, %v1958_v34  ;;  %v666_v61 = vadd.f32 %v658_v47, %v1948_v21  ;;  %v668_v1 = vadd.f32 %v660_v48, %v1950_v22 }
 0x16e   : > { %v673_v57 = vmul.f32 0.7978846, %v665_v51  ;;  %v675_v58 = vmul.f32 0.7978846, %v667_v52  ;;  %v669_v59 = vadd.f32 %v661_v53, %v586_v27  ;;  %v671_v60 = vadd.f32 %v663_v54, %v629_v28  ;;  %v1278_v53 = vld [vmem:[%s2050_s4] ss:$0 sm:$0xff] }
 0x16f   : > { %v670_v62 = vadd.f32 %v662_v55, %v1956_v33  ;;  %v674_v2 = vmul.f32 0.7978846, %v666_v61  ;;  %v672_v4 = vadd.f32 %v664_v56, %v1958_v34  ;;  %v676_v5 = vmul.f32 0.7978846, %v668_v1 }
 0x170   : > { %1502 = vtanh.f32 %v673_v57  ;;  %v677_v63 = vmul.f32 0.7978846, %v669_v59  ;;  %v679_v0 = vmul.f32 0.7978846, %v671_v60  ;;  %v633_v13 = vmul.f32 0.5, %v1944_v17 }
 0x171   : > { %1504 = vtanh.f32 %v675_v58  ;;  %v678_v3 = vmul.f32 0.7978846, %v670_v62  ;;  %v680_v6 = vmul.f32 0.7978846, %v672_v4  ;;  %v637_v14 = vmul.f32 0.5, %v586_v27 }
 0x172   : > { %1506 = vtanh.f32 %v677_v63  ;;  %v635_v19 = vmul.f32 0.5, %v1946_v18  ;;  %v639_v20 = vmul.f32 0.5, %v629_v28  ;;  %v634_v25 = vmul.f32 0.5, %v1948_v21 }
 0x173   : > { %1508 = vtanh.f32 %v679_v0  ;;  %v638_v32 = vmul.f32 0.5, %v1956_v33  ;;  %v636_v27 = vmul.f32 0.5, %v1950_v22  ;;  %v640_v38 = vmul.f32 0.5, %v1958_v34 }
 0x174   : > { %1510 = vtanh.f32 %v674_v2 }
 0x175   : > { %1512 = vtanh.f32 %v678_v3 }
 0x176   : > { %1514 = vtanh.f32 %v676_v5 }
 0x177   : > { %1516 = vtanh.f32 %v680_v6 }
 0x17a   : > { %v1503_v7 = vpop.eup %1502 }
 0x17b   : > { %v1505_v8 = vpop.eup %1504  ;;  %v689_v9 = vadd.f32 1.0, %v1503_v7 }
 0x17c   : > { %v1507_v10 = vpop.eup %1506  ;;  %v691_v11 = vadd.f32 1.0, %v1505_v8 }
 0x17d   : > { %v1509_v12 = vpop.eup %1508  ;;  %v693_v15 = vadd.f32 1.0, %v1507_v10  ;;  %v697_v29 = vmul.f32 %v689_v9, %v633_v13 }
 0x17e   : > { %v1511_v16 = vpop.eup %1510  ;;  %v695_v23 = vadd.f32 1.0, %v1509_v12  ;;  %v699_v36 = vmul.f32 %v691_v11, %v635_v19 }
 0x17f   : > { %v1513_v24 = vpop.eup %1512  ;;  %v690_v26 = vadd.f32 1.0, %v1511_v16  ;;  %v701_v30 = vmul.f32 %v693_v15, %v637_v14 }
 0x180   : > { %v1515_v31 = vpop.eup %1514  ;;  %v694_v35 = vadd.f32 1.0, %v1513_v24  ;;  %v703_v37 = vmul.f32 %v695_v23, %v639_v20 }
 0x181   : > { %v1517_v17 = vpop.eup %1516  ;;  %v692_v18 = vadd.f32 1.0, %v1515_v31  ;;  %v707_v28 = vpack.c.bf16 %v701_v30, %v697_v29  ;;  %v698_v39 = vmul.f32 %v690_v26, %v634_v25 }
 0x182   : > { %v702_v40 = vmul.f32 %v694_v35, %v638_v32  ;;  %v696_v41 = vadd.f32 1.0, %v1517_v17  ;;  %v709_v21 = vpack.c.bf16 %v703_v37, %v699_v36 }
 0x183   : > { %v700_v43 = vmul.f32 %v692_v18, %v636_v27 }
 0x184   : > { %v708_v42 = vpack.c.bf16 %v702_v40, %v698_v39  ;;  %v704_v44 = vmul.f32 %v696_v41, %v640_v38 }
 0x186   : > { %999 = vmatprep.mubr.bf16.mxu0 %v708_v42  ;;  %v710_v33 = vpack.c.bf16 %v704_v44, %v700_v43 }
 0x187   : > { %1000 = vmatmul.mubr.bf16.vlgmr.msra.gmra.mrb[4].mxu0 %v707_v28 }
 0x188   : > { %1040 = vmatprep.mubr.bf16.mxu1 %v710_v33 }
 0x189   : > { %1041 = vmatmul.mubr.bf16.vlgmr.msra.gmra.mrb[4].mxu1 %v709_v21 }
 0x25a   : > { %v1302_v45 = vpop.f32.mrb[4].mxu0 }
 0x25b   : > { %v1303_v22 = vpop.f32.mrb[5].mxu0 }
 0x25c   : > { %v1324_v46 = vpop.f32.mrb[4].mxu1  ;;  %v1304_v34 = vadd.f32 %v1303_v22, %v1302_v45  ;;  %v1305_v47 = vpop.f32.mrb[6].mxu0 }
 0x25d   : > { %v1325_v48 = vpop.f32.mrb[5].mxu1  ;;  %v1306_v49 = vpop.f32.mrb[7].mxu0 }
 0x25e   : > { %v1326_v50 = vadd.f32 %v1325_v48, %v1324_v46  ;;  %v1327_v51 = vpop.f32.mrb[6].mxu1  ;;  %v1307_v52 = vadd.f32 %v1306_v49, %v1305_v47 }
 0x25f   : > { %v1328_v54 = vpop.f32.mrb[7].mxu1 }
 0x260   : > { %v1043_v55 = vadd.f32 %v1326_v50, %v1304_v34  ;;  %v1329_v56 = vadd.f32 %v1328_v54, %v1327_v51 }
 0x262   : > { %v1065_v57 = vadd.f32 %v1278_v53, %v1043_v55  ;;  %v1046_v58 = vadd.f32 %v1329_v56, %v1307_v52 }
 0x264   : > { %1067 = vst [vmem:[%s313_s6] sm:$0xff] %v1065_v57  ;;  %v1066_v59 = vadd.f32 %v1278_v53, %v1046_v58 }
 0x266   : > { %1068 = vst [vmem:[%s313_s6 + $0x8] sm:$0xff] %v1066_v59 }
 0x267   : > { %1617 = shalt.err (!%p1614_p11)
}
 0x268   : > { %s1618_s26 = scalar_lea.hbm %s1997_s13, 256  ;;  %s1622_s25 = scalar_lea.hbm %s2051_s5, 512 }
 0x269   : > { %p1619_p0 = scmp.ne.s32.totalorder %s1997_s13, %s1618_s26  ;;  %p1623_p6 = scmp.lt.u32.totalorder %s1997_s13, %s2051_s5 }
 0x26a   : > { %p1624_p7 = scmp.lt.u32.totalorder %s1622_s25, %s1618_s26  ;;  %p1626_p8 = scmp.lt.u32.totalorder %s1618_s26, %s1997_s13 }
 0x26b   : > { %p1620_p4 = pnand %p1619_p0, %p2066_p12 }
 0x26c   : > { %p1625_p2 = por %p1624_p7, %p1623_p6 }
 0x26d   : > { %p1621_p13 = pneg %p1620_p4 }
 0x26e   : > { %p1627_p1 = por %p1626_p8, %p1625_p2 }
 0x270   : > { %p1628_p10 = pnand %p1627_p1, %p1621_p13 }
 0x272   : > { %1631 = shalt.err (!%p1628_p10)
}
 0x273   : > { %s1703_s8 = smov 128   ;;  %s1704_s10 = smov 8  }
 0x274   : > { %1340 = dma.vmem_to_hbm [thread:$0]  (%p2066_p12), %s1992_s9, 256, %s1997_s13, %s1070_s16, %s1703_s8, %s1703_s8, %s1704_s10  }
 0x275 PF: > { %s1098_s7 = sand.u32 1, %s1670_s18   ;;  %p2067_p3 = scmp.ne.s32.totalorder %s2059_s29, 0 }
 0x276   : > { %p2068_p5 = scmp.ge.s32.totalorder %s1690_s23, 2  ;;  %s1099_s21 = scalar_lea.sflag [#allocation5], %s1098_s7 }
 0x278   : > { %p1354_p9 = pnand %p2068_p5, %p2067_p3 }
 0x27a   : > { %1665 = dma.done.wait (!%p1354_p9), %s1099_s21, 256  }
 0x27b   : > { %1667 = vsyncadd (!%p1354_p9), %s1099_s21, 4294967040  ;;  %s22_s23 = sadd.s32 1, %s1690_s23   ;;  %s2069_s18 = smov %s1674_s19 }
 0x27c   : > { %p19_p11 = scmp.ge.s32.totalorder %s22_s23, 4   ;;  %s2070_s19 = smov %s1678_s20 }
 0x27d   : > { %s2071_s20 = smov %s1877_s17  ;;  %s2072_s21 = smov %s1686_s22 }
 0x27e   : > { %s2073_s22 = smov %s2075_s12  ;;  %21 = sbr.rel (!%p19_p11) target bundleno = 7 (0x7), region = 106 }
 0x285   :  { %1104 = vsyncpa [#allocation4], 1 }
 0x286   :  { %1106 = vsyncpa [#allocation4 + $0x1], 1 }
 0x287   :  { %1107 = vsyncpa [#allocation7], 1 }
 0x288   :  { %1108 = vsyncpa [#allocation5], 1 }
 0x289   :  { %1110 = vsyncpa [#allocation5 + $0x1], 1 }

</bundles_post_ra>
